<compile_context>
chip_gen: v7x
topology: tpu7x:2x2x1
jax: 0.10.0
libtpu: 0.0.40
codegen_flags: <defaults>
</compile_context>

<pallas_src>
import math

import jax
import jax.numpy as jnp
from jax import lax
from jax.experimental import pallas as pl
from jax.experimental.pallas import tpu as pltpu

_INV_SQRT2 = 0.7071067811865476
_LANE = 128
_CHUNK_ROWS = 256        # in-kernel compute chunk (rows of G points) -> caps f32 temps
_SMALL_ROWS = 1024       # below this many rows, use a single grid step


def _round_up(a, b):
    return ((a + b - 1) // b) * b


def _cdiv(a, b):
    return (a + b - 1) // b


def _group_size(c_in, c_out):
    """Smallest G so that G*c_in and G*c_out are multiples of 128 (lane-dense)."""
    g_in = _LANE // math.gcd(_LANE, c_in)
    g_out = _LANE // math.gcd(_LANE, c_out)
    return (g_in * g_out) // math.gcd(g_in, g_out)   # lcm; always divides 128


def _choose_row_tile(R, tile_points, G):
    """Pick (rows_per_block, grid) for R rows of G points each."""
    if R <= _SMALL_ROWS:
        return R, 1                              # one block; block dim == full dim is legal
    req = max(8, (max(1, tile_points // G) // 8) * 8)
    cap = _round_up(_cdiv(R, 2), 8)              # ensure >= 2 grid steps (v7x megacore)
    tm_r = max(8, min(req, cap))
    grid = _cdiv(R, tm_r)
    tm_r = _round_up(_cdiv(R, grid), 8)          # rebalance -> padding < 8 rows per step
    return tm_r, grid


def _shared_mlp_kernel(x_ref, w1_ref, b1_ref, w2_ref, b2_ref, o_ref):
    """x_ref: (rows, G*C_in) tile of grouped points; o_ref: (rows, G*C_out)."""
    rows = x_ref.shape[0]
    w1 = w1_ref[...]            # (G*C_in, G*H)   block-diagonal, resident
    w2 = w2_ref[...]            # (G*H, G*C_out)  block-diagonal, resident
    b1 = b1_ref[...]            # (1, G*H)        f32
    b2 = b2_ref[...]            # (1, G*C_out)    f32

    def compute(xs):
        # fc1: lane-dense MXU matmul, f32 accumulation.
        h = jnp.dot(xs, w1, preferred_element_type=jnp.float32) + b1
        # Exact erf GELU (matches torch.nn.GELU() default).
        h = 0.5 * h * (1.0 + lax.erf(h * _INV_SQRT2))
        # dropout(p=0.0) == identity.
        # fc2: keep h in f32 (no downcast) -> MXU with f32 accumulation.
        o = jnp.dot(h, w2, preferred_element_type=jnp.float32) + b2
        return o.astype(o_ref.dtype)

    ck = min(rows, _CHUNK_ROWS)
    n_full = rows // ck
    rem = rows - n_full * ck

    if n_full == 1 and rem == 0:
        o_ref[...] = compute(x_ref[...])
    else:
        def body(i, carry):
            start = pl.multiple_of(i * ck, ck)
            o_ref[pl.ds(start, ck), :] = compute(x_ref[pl.ds(start, ck), :])
            return carry

        lax.fori_loop(0, n_full, body, 0, unroll=n_full <= 16)
        if rem > 0:                                # static tail chunk
            start = n_full * ck
            o_ref[pl.ds(start, rem), :] = compute(x_ref[pl.ds(start, rem), :])


def shared_mlp(x, w1, b1, w2, b2, *, tile_points=65536):
    """SharedMlp forward (channel_last=True, drop=0.0).

    Args:
      x:  (B, N, C_in)
      w1: (H, C_in, 1)   Conv1d weight of fc1
      b1: (H,)           Conv1d bias of fc1
      w2: (C_out, H, 1)  Conv1d weight of fc2
      b2: (C_out,)       Conv1d bias of fc2
    Returns:
      (B, N, C_out), same dtype as x.
    """
    B, N, C_in = x.shape
    H = w1.shape[0]
    C_out = w2.shape[0]
    M = B * N

    G = _group_size(C_in, C_out)
    D_in, D_h, D_out = G * C_in, G * H, G * C_out

    R = _cdiv(M, G)
    tm_r, grid = _choose_row_tile(R, tile_points, G)
    R_pad = grid * tm_r
    M_pad = R_pad * G

    # Native layout: pure reshapes (free).  Pad only when M is ragged.
    x2d = x.reshape(M, C_in)
    if M_pad != M:
        x2d = jnp.pad(x2d, ((0, M_pad - M), (0, 0)))
    x_g = x2d.reshape(R_pad, D_in)

    # Block-diagonal Conv1d(k=1) weights (built once; ~0.5 MiB each here).
    wdt = w1.dtype
    eye = jnp.eye(G, dtype=wdt)
    w1_t = jnp.transpose(w1[:, :, 0])                                  # (C_in, H)
    w2_t = jnp.transpose(w2[:, :, 0])                                  # (H, C_out)
    w1_bd = (eye[:, None, :, None] * w1_t[None, :, None, :]).reshape(D_in, D_h)
    w2_bd = (eye[:, None, :, None] * w2_t[None, :, None, :]).reshape(D_h, D_out)
    b1_t = jnp.tile(b1.astype(jnp.float32), G).reshape(1, D_h)
    b2_t = jnp.tile(b2.astype(jnp.float32), G).reshape(1, D_out)

    itemsize = jnp.dtype(x.dtype).itemsize
    w_itemsize = jnp.dtype(wdt).itemsize
    cost = pl.CostEstimate(
        flops=2 * R_pad * (D_in * D_h + D_h * D_out),
        transcendentals=R_pad * D_h,
        bytes_accessed=R_pad * (D_in + D_out) * itemsize
        + (D_in * D_h + D_h * D_out) * w_itemsize,
    )

    out_g = pl.pallas_call(
        _shared_mlp_kernel,
        out_shape=jax.ShapeDtypeStruct((R_pad, D_out), x.dtype),
        grid=(grid,),
        in_specs=[
            pl.BlockSpec((tm_r, D_in), lambda i: (i, 0)),     # x tile (lane-dense)
            pl.BlockSpec((D_in, D_h), lambda i: (0, 0)),      # W1 block-diag (resident)
            pl.BlockSpec((1, D_h), lambda i: (0, 0)),         # b1 (resident)
            pl.BlockSpec((D_h, D_out), lambda i: (0, 0)),     # W2 block-diag (resident)
            pl.BlockSpec((1, D_out), lambda i: (0, 0)),       # b2 (resident)
        ],
        out_specs=pl.BlockSpec((tm_r, D_out), lambda i: (i, 0)),
        compiler_params=pltpu.CompilerParams(
            dimension_semantics=("parallel",)),
        cost_estimate=cost,
    )(x_g, w1_bd, b1_t, w2_bd, b2_t)

    out2d = out_g.reshape(M_pad, C_out)
    if M_pad != M:
        out2d = out2d[:M]
    return out2d.reshape(B, N, C_out)


def _reference(x, w1, b1, w2, b2):
    # Pure-JAX reference of the PyTorch forward (channel_last=True, drop=0.0).
    w1_mat = jnp.transpose(w1[:, :, 0])
    w2_mat = jnp.transpose(w2[:, :, 0])
    h = jnp.einsum("bnc,ch->bnh", x, w1_mat) + b1
    h = jax.nn.gelu(h, approximate=False)
    return jnp.einsum("bnh,ho->bno", h, w2_mat) + b2


if __name__ == "__main__":
    # SharedMlp(in_features=4, hidden_features=32, out_features=4, drop=0.0)
    B, N, C_in, H, C_out = 2, 16, 4, 32, 4

    key = jax.random.PRNGKey(0)
    kx, k1, k2, k3, k4 = jax.random.split(key, 5)

    x = jax.random.normal(kx, (B, N, C_in), dtype=jnp.float32)
    # Deterministic synthetic parameters (Conv1d shapes: (out, in, 1), (out,))
    w1 = jax.random.normal(k1, (H, C_in, 1), dtype=jnp.float32) * 0.1
    b1 = jax.random.normal(k2, (H,), dtype=jnp.float32) * 0.1
    w2 = jax.random.normal(k3, (C_out, H, 1), dtype=jnp.float32) * 0.1
    b2 = jax.random.normal(k4, (C_out,), dtype=jnp.float32) * 0.1

    out = jax.block_until_ready(shared_mlp(x, w1, b1, w2, b2))
    ref = _reference(x, w1, b1, w2, b2)
    assert out.shape == (B, N, C_out)
    assert jnp.allclose(out, ref, atol=1e-5, rtol=1e-5), "mismatch vs reference"

    # Second small check: ragged M (exercises the bounded padding path).
    B2, N2 = 3, 37
    x2 = jax.random.normal(kx, (B2, N2, C_in), dtype=jnp.float32)
    out2 = jax.block_until_ready(shared_mlp(x2, w1, b1, w2, b2))
    ref2 = _reference(x2, w1, b1, w2, b2)
    assert out2.shape == (B2, N2, C_out)
    assert jnp.allclose(out2, ref2, atol=1e-5, rtol=1e-5), "mismatch vs reference (ragged)"

    print("KERNEL_OK")
</pallas_src>

<mosaic_0001>
module attributes {stable_mosaic.version = 11 : i64} {
  func.func @_shared_mlp_kernel(%arg0: i32, %arg1: memref<1x128xf32, #tpu.memory_space<vmem>>, %arg2: memref<128x1024xf32, #tpu.memory_space<vmem>>, %arg3: memref<1x1024xf32, #tpu.memory_space<vmem>>, %arg4: memref<1024x128xf32, #tpu.memory_space<vmem>>, %arg5: memref<1x128xf32, #tpu.memory_space<vmem>>, %arg6: memref<1x128xf32, #tpu.memory_space<vmem>>) attributes {dimension_semantics = [#tpu.dimension_semantics<parallel>], iteration_bounds = array<i64: 1>, scalar_prefetch = 0 : i64, scratch_operands = 0 : i64, tpu.core_type = #tpu.core_type<tc>, window_params = [{transform_indices = @transform_0, window_bounds = array<i64: 1, 128>}, {pipeline_mode = #tpu.pipeline_mode<synchronous>, transform_indices = @transform_1, window_bounds = array<i64: 128, 1024>}, {pipeline_mode = #tpu.pipeline_mode<synchronous>, transform_indices = @transform_2, window_bounds = array<i64: 1, 1024>}, {pipeline_mode = #tpu.pipeline_mode<synchronous>, transform_indices = @transform_3, window_bounds = array<i64: 1024, 128>}, {pipeline_mode = #tpu.pipeline_mode<synchronous>, transform_indices = @transform_4, window_bounds = array<i64: 1, 128>}, {transform_indices = @transform_5, window_bounds = array<i64: 1, 128>}]} {
    %c0 = arith.constant 0 : index
    %c0_0 = arith.constant 0 : index
    %0 = vector.load %arg2[%c0, %c0_0] : memref<128x1024xf32, #tpu.memory_space<vmem>>, vector<128x1024xf32>
    %c0_1 = arith.constant 0 : index
    %c0_2 = arith.constant 0 : index
    %1 = vector.load %arg4[%c0_1, %c0_2] : memref<1024x128xf32, #tpu.memory_space<vmem>>, vector<1024x128xf32>
    %c0_3 = arith.constant 0 : index
    %c0_4 = arith.constant 0 : index
    %2 = vector.load %arg3[%c0_3, %c0_4] : memref<1x1024xf32, #tpu.memory_space<vmem>>, vector<1x1024xf32>
    %c0_5 = arith.constant 0 : index
    %c0_6 = arith.constant 0 : index
    %3 = vector.load %arg5[%c0_5, %c0_6] : memref<1x128xf32, #tpu.memory_space<vmem>>, vector<1x128xf32>
    %c0_7 = arith.constant 0 : index
    %c0_8 = arith.constant 0 : index
    %4 = vector.load %arg1[%c0_7, %c0_8] : memref<1x128xf32, #tpu.memory_space<vmem>>, vector<1x128xf32>
    %cst = arith.constant dense<0.000000e+00> : vector<1x1024xf32>
    %5 = tpu.matmul %4, %0, %cst {dimension_numbers = #tpu.dot_dimension_numbers<[1], [0], [0], [1], [0, 0, 1, 1], [], []>} : vector<1x128xf32>, vector<128x1024xf32>, vector<1x1024xf32> -> vector<1x1024xf32>
    %6 = arith.addf %5, %2 : vector<1x1024xf32>
    %cst_9 = arith.constant 5.000000e-01 : f32
    %7 = vector.broadcast %cst_9 : f32 to vector<1x1024xf32>
    %8 = arith.mulf %7, %6 : vector<1x1024xf32>
    %cst_10 = arith.constant 0.707106769 : f32
    %9 = vector.broadcast %cst_10 : f32 to vector<1x1024xf32>
    %10 = arith.mulf %6, %9 : vector<1x1024xf32>
    %11 = math.erf %10 : vector<1x1024xf32>
    %cst_11 = arith.constant 1.000000e+00 : f32
    %12 = vector.broadcast %cst_11 : f32 to vector<1x1024xf32>
    %13 = arith.addf %12, %11 : vector<1x1024xf32>
    %14 = arith.mulf %8, %13 : vector<1x1024xf32>
    %cst_12 = arith.constant dense<0.000000e+00> : vector<1x128xf32>
    %15 = tpu.matmul %14, %1, %cst_12 {dimension_numbers = #tpu.dot_dimension_numbers<[1], [0], [0], [1], [0, 0, 1, 1], [], []>} : vector<1x1024xf32>, vector<1024x128xf32>, vector<1x128xf32> -> vector<1x128xf32>
    %16 = arith.addf %15, %3 : vector<1x128xf32>
    %c0_13 = arith.constant 0 : index
    %c0_14 = arith.constant 0 : index
    %17 = vector.load %arg6[%c0_13, %c0_14] : memref<1x128xf32, #tpu.memory_space<vmem>>, vector<1x128xf32>
    tpu.vector_store %arg6[%c0_13, %c0_14], %16 {strides = array<i32>} : memref<1x128xf32, #tpu.memory_space<vmem>>, vector<1x128xf32>,
    return
  }
  func.func @transform_0(%arg0: i32) -> (i32, i32) {
    %c0_i32 = arith.constant 0 : i32
    %c0_i32_0 = arith.constant 0 : i32
    return %arg0, %c0_i32 : i32, i32
  }
  func.func @transform_1(%arg0: i32) -> (i32, i32) {
    %c0_i32 = arith.constant 0 : i32
    %c0_i32_0 = arith.constant 0 : i32
    %c0_i32_1 = arith.constant 0 : i32
    return %c0_i32, %c0_i32_0 : i32, i32
  }
  func.func @transform_2(%arg0: i32) -> (i32, i32) {
    %c0_i32 = arith.constant 0 : i32
    %c0_i32_0 = arith.constant 0 : i32
    %c0_i32_1 = arith.constant 0 : i32
    return %c0_i32, %c0_i32_0 : i32, i32
  }
  func.func @transform_3(%arg0: i32) -> (i32, i32) {
    %c0_i32 = arith.constant 0 : i32
    %c0_i32_0 = arith.constant 0 : i32
    %c0_i32_1 = arith.constant 0 : i32
    return %c0_i32, %c0_i32_0 : i32, i32
  }
  func.func @transform_4(%arg0: i32) -> (i32, i32) {
    %c0_i32 = arith.constant 0 : i32
    %c0_i32_0 = arith.constant 0 : i32
    %c0_i32_1 = arith.constant 0 : i32
    return %c0_i32, %c0_i32_0 : i32, i32
  }
  func.func @transform_5(%arg0: i32) -> (i32, i32) {
    %c0_i32 = arith.constant 0 : i32
    %c0_i32_0 = arith.constant 0 : i32
    return %arg0, %c0_i32 : i32, i32
  }
}

</mosaic_0001>

<bundles_post_ra>
// kernel: tpu_custom_call.1
= control target key start
LH: loop header
LB: loop body
LE: loop exit
PB: predicated region body
PF: predicated region fallthrough
CT: control target
= control target key end

     0   :  { %10 = vsyncpa [#allocation3], 0  ;;  %s1683_s0 = inlined_call_operand.hbm [shape: f32[1,128], index: 0, kind: input, shape index: {}]   ;;  %s1684_s1 = inlined_call_operand.hbm [shape: f32[128,1024], index: 1, kind: input, shape index: {}]   ;;  %s1685_s2 = inlined_call_operand.hbm [shape: f32[1,1024], index: 2, kind: input, shape index: {}]   ;;  %s1686_s3 = inlined_call_operand.hbm [shape: f32[1024,128], index: 3, kind: input, shape index: {}]   ;;  %s1687_s4 = inlined_call_operand.vmem [shape: f32[1,128], index: 4, kind: input, shape index: {}]   ;;  %s1688_s5 = inlined_call_operand.hbm [shape: f32[1,128], index: 5, kind: output, shape index: {}]  }
   0x1   :  { %11 = vsyncpa [#allocation6], 0 }
   0x2   :  { %12 = vsyncpa [#allocation9], 0 }
   0x3   :  { %13 = vsyncpa [#allocation4], 0  ;;  %s1534_s18 = smov [#allocation5]   ;;  %s1416_s22 = scalar_lea.hbm %s1684_s1, 16384 }
   0x4   :  { %s29_s19 = sshll.u32 %s1534_s18, 4  ;;  %p1417_p0 = scmp.ne.s32.totalorder %s1684_s1, %s1416_s22  ;;  %s30_s19 = int_to_ptr.vmem [resolvable:$true] %s29_s19 }
   0x5   :  { %p1420_p1 = scmp.lt.u32.totalorder %s1416_s22, %s1684_s1 }
   0x7   :  { %p1422_p2 = pnand %p1420_p1, %p1417_p0 }
   0x9   :  { %1425 = shalt.err (!%p1422_p2)
}
   0xa   :  { %s1426_s27 = scalar_lea.vmem %s30_s19, 16384  ;;  %p1431_p4 = scmp.lt.s32.totalorder %s30_s19, %s30_s19 }
   0xb   :  { %p1427_p3 = scmp.ne.s32.totalorder %s30_s19, %s1426_s27  ;;  %p1432_p5 = scmp.lt.s32.totalorder %s1426_s27, %s1426_s27 }
   0xd   :  { %p1433_p6 = por %p1432_p5, %p1431_p4 }
   0xf   :  { %p1434_p7 = pnand %p1433_p6, %p1427_p3 }
  0x11   :  { %1437 = shalt.err (!%p1434_p7)
}
  0x12   :  { %s1535_s28 = smov 1024   ;;  %s1536_s29 = smov 64  }
  0x13   :  { %35 = dma.hbm_to_vmem [thread:$0]  %s1684_s1, 16384, %s30_s19, [#allocation6], %s1535_s28, %s1535_s28, %s1536_s29  }
  0x14   :  { %s1537_s7 = smov [#allocation2]   ;;  %s1538_s9 = smov [#allocation7]  }
  0x15   :  { %s20_s8 = sshll.u32 %s1537_s7, 4  ;;  %s42_s10 = sshll.u32 %s1538_s9, 4  ;;  %s21_s8 = int_to_ptr.vmem [resolvable:$true] %s20_s8  ;;  %s43_s10 = int_to_ptr.vmem [resolvable:$true] %s42_s10 }
  0x16   :  { %s1438_s13 = scalar_lea.hbm %s1683_s0, 16 }
  0x17   :  { %p1439_p8 = scmp.ne.s32.totalorder %s1683_s0, %s1438_s13  ;;  %p1442_p9 = scmp.lt.u32.totalorder %s1438_s13, %s1683_s0 }
  0x19   :  { %p1444_p10 = pnand %p1442_p9, %p1439_p8 }
  0x1b   :  { %1447 = shalt.err (!%p1444_p10)
}
  0x1c   :  { %s1448_s1 = scalar_lea.vmem %s21_s8, 16  ;;  %s1452_s18 = scalar_lea.vmem %s21_s8, 32 }
  0x1d   :  { %p1449_p11 = scmp.ne.s32.totalorder %s21_s8, %s1448_s1  ;;  %p1453_p12 = scmp.lt.s32.totalorder %s21_s8, %s21_s8 }
  0x1e   :  { %p1454_p13 = scmp.lt.s32.totalorder %s1452_s18, %s1448_s1 }
  0x20   :  { %p1455_p0 = por %p1454_p13, %p1453_p12 }
  0x22   :  { %p1456_p1 = pnand %p1455_p0, %p1449_p11 }
  0x24   :  { %1459 = shalt.err (!%p1456_p1)
}
  0x25   :  { %23 = dma.hbm_to_vmem [thread:$0]  %s1683_s0, 16, %s21_s8, [#allocation3]  }
  0x26   :  { %s1460_s23 = scalar_lea.hbm %s1685_s2, 128 }
  0x27   :  { %p1461_p2 = scmp.ne.s32.totalorder %s1685_s2, %s1460_s23  ;;  %p1464_p3 = scmp.lt.u32.totalorder %s1460_s23, %s1685_s2 }
  0x29   :  { %p1466_p4 = pnand %p1464_p3, %p1461_p2 }
  0x2b   :  { %1469 = shalt.err (!%p1466_p4)
}
  0x2c   :  { %s1470_s28 = scalar_lea.vmem %s43_s10, 128  ;;  %p1475_p6 = scmp.lt.s32.totalorder %s43_s10, %s43_s10 }
  0x2d   :  { %p1471_p5 = scmp.ne.s32.totalorder %s43_s10, %s1470_s28  ;;  %p1476_p7 = scmp.lt.s32.totalorder %s1470_s28, %s1470_s28 }
  0x2f   :  { %p1477_p8 = por %p1476_p7, %p1475_p6 }
  0x31   :  { %p1478_p9 = pnand %p1477_p8, %p1471_p5 }
  0x33   :  { %1481 = shalt.err (!%p1478_p9)
}
  0x34   :  { %45 = dma.hbm_to_vmem [thread:$0]  %s1685_s2, 128, %s43_s10, [#allocation6]  }
  0x35   :  { %s1539_s30 = smov [#allocation8]   ;;  %s1482_s9 = scalar_lea.hbm %s1686_s3, 16384 }
  0x36   :  { %s51_s6 = sshll.u32 %s1539_s30, 4  ;;  %p1483_p10 = scmp.ne.s32.totalorder %s1686_s3, %s1482_s9  ;;  %s52_s6 = int_to_ptr.vmem [resolvable:$true] %s51_s6 }
  0x37   :  { %p1486_p11 = scmp.lt.u32.totalorder %s1482_s9, %s1686_s3 }
  0x39   :  { %p1488_p12 = pnand %p1486_p11, %p1483_p10 }
  0x3b   :  { %1491 = shalt.err (!%p1488_p12)
}
  0x3c   :  { %s1492_s15 = scalar_lea.vmem %s52_s6, 16384  ;;  %p1497_p0 = scmp.lt.s32.totalorder %s52_s6, %s52_s6 }
  0x3d   :  { %p1493_p13 = scmp.ne.s32.totalorder %s52_s6, %s1492_s15  ;;  %p1498_p1 = scmp.lt.s32.totalorder %s1492_s15, %s1492_s15 }
  0x3f   :  { %p1499_p2 = por %p1498_p1, %p1497_p0 }
  0x41   :  { %p1500_p3 = pnand %p1499_p2, %p1493_p13 }
  0x43   :  { %1503 = shalt.err (!%p1500_p3)
}
  0x44   :  { %s1540_s2 = smov 128   ;;  %s1541_s10 = smov 8  }
  0x45   :  { %57 = dma.hbm_to_vmem [thread:$0]  %s1686_s3, 16384, %s52_s6, [#allocation9], %s1540_s2, %s1540_s2, %s1541_s10  }
  0x46   :  { %1526 = dma.done.wait [#allocation3], 16  }
  0x47   :  { %1527 = vsyncadd [#allocation3], 4294967280 }
  0x48   :  { %1528 = dma.done.wait [#allocation6], 16512  }
  0x49   :  { %1529 = vsyncadd [#allocation6], 4294950784 }
  0x4a   :  { %1530 = dma.done.wait [#allocation9], 16384  }
  0x4b   :  { %1531 = vsyncadd [#allocation9], 4294950912  ;;  %v1542_v0 = vmov 0.0   ;;  %v73_v1 = vld [vmem:[#allocation5 + $0x8] sm:$0xff]  ;;  %v75_v3 = vld [vmem:[#allocation5 + $0x18] sm:$0xff]  ;;  %s1543_s18 = smov [#allocation10]  }
  0x4c   :  { %436 = vmatprep.mubr.f32.mxu0 %v1542_v0  ;;  %507 = vmatprep.mubr.f32.mxu1 %v1542_v0  ;;  %v81_v2 = vld [vmem:[#allocation5 + $0x48] sm:$0xff]  ;;  %v83_v5 = vld [vmem:[#allocation5 + $0x58] sm:$0xff]  ;;  %v72_v6 = vld [vmem:[#allocation5] sm:$0xff]  ;;  %s983_s19 = sshll.u32 %s1543_s18, 4  ;;  %s984_s19 = int_to_ptr.vmem [resolvable:$true] %s983_s19 }
  0x4d   :  { %v1134_v4 = vpack.c.bf16 %v81_v2, %v73_v1  ;;  %v80_v7 = vld [vmem:[#allocation5 + $0x40] sm:$0xff]  ;;  %v1166_v8 = vpack.c.bf16 %v83_v5, %v75_v3  ;;  %v74_v10 = vld [vmem:[#allocation5 + $0x10] sm:$0xff]  ;;  %v89_v12 = vld [vmem:[#allocation5 + $0x88] sm:$0xff]  ;;  %s1504_s20 = scalar_lea.vmem %s984_s19, 16  ;;  %p1509_p5 = scmp.lt.s32.totalorder %s984_s19, %s984_s19 }
  0x4e   :  { %v1136_v9 = vpack.c.bf16 %v80_v7, %v72_v6  ;;  %v82_v11 = vld [vmem:[#allocation5 + $0x50] sm:$0xff]  ;;  %v97_v14 = vld [vmem:[#allocation5 + $0xc8] sm:$0xff]  ;;  %v91_v15 = vld [vmem:[#allocation5 + $0x98] sm:$0xff]  ;;  %p1505_p4 = scmp.ne.s32.totalorder %s984_s19, %s1504_s20 }
  0x4f   :  { %1135 = vmatprep.subr.bf16.mxu0 %v1134_v4  ;;  %v1168_v13 = vpack.c.bf16 %v82_v11, %v74_v10  ;;  %v99_v16 = vld [vmem:[#allocation5 + $0xd8] sm:$0xff]  ;;  %1167 = vmatprep.subr.bf16.mxu1 %v1166_v8  ;;  %v1138_v17 = vpack.c.bf16 %v97_v14, %v89_v12  ;;  %v88_v19 = vld [vmem:[#allocation5 + $0x80] sm:$0xff]  ;;  %v90_v21 = vld [vmem:[#allocation5 + $0x90] sm:$0xff] }
  0x50   :  { %1137 = vmatpush1.bf16.msra.mxu0 %v1136_v9  ;;  %v1170_v18 = vpack.c.bf16 %v99_v16, %v91_v15  ;;  %v96_v20 = vld [vmem:[#allocation5 + $0xc0] sm:$0xff]  ;;  %v98_v23 = vld [vmem:[#allocation5 + $0xd0] sm:$0xff]  ;;  %v105_v24 = vld [vmem:[#allocation5 + $0x108] sm:$0xff] }
  0x51   :  { %1169 = vmatpush1.bf16.msra.mxu1 %v1168_v13  ;;  %v1140_v22 = vpack.c.bf16 %v96_v20, %v88_v19  ;;  %v113_v25 = vld [vmem:[#allocation5 + $0x148] sm:$0xff]  ;;  %1139 = vmatprep.subr.bf16.mxu0 %v1138_v17  ;;  %v1172_v26 = vpack.c.bf16 %v98_v23, %v90_v21  ;;  %v107_v28 = vld [vmem:[#allocation5 + $0x118] sm:$0xff]  ;;  %v104_v30 = vld [vmem:[#allocation5 + $0x100] sm:$0xff] }
  0x52   :  { %1171 = vmatprep.subr.bf16.mxu1 %v1170_v18  ;;  %v1142_v27 = vpack.c.bf16 %v113_v25, %v105_v24  ;;  %v115_v29 = vld [vmem:[#allocation5 + $0x158] sm:$0xff]  ;;  %v112_v32 = vld [vmem:[#allocation5 + $0x140] sm:$0xff]  ;;  %v106_v33 = vld [vmem:[#allocation5 + $0x110] sm:$0xff] }
  0x53   :  { %v1174_v31 = vpack.c.bf16 %v115_v29, %v107_v28  ;;  %v114_v34 = vld [vmem:[#allocation5 + $0x150] sm:$0xff]  ;;  %v1144_v35 = vpack.c.bf16 %v112_v32, %v104_v30  ;;  %v121_v36 = vld [vmem:[#allocation5 + $0x188] sm:$0xff]  ;;  %v123_v38 = vld [vmem:[#allocation5 + $0x198] sm:$0xff] }
  0x54   :  { %1141 = vmatpush1.bf16.msra.mxu0 %v1140_v22  ;;  %v129_v37 = vld [vmem:[#allocation5 + $0x1c8] sm:$0xff]  ;;  %v1176_v39 = vpack.c.bf16 %v114_v34, %v106_v33  ;;  %v131_v41 = vld [vmem:[#allocation5 + $0x1d8] sm:$0xff]  ;;  %v120_v42 = vld [vmem:[#allocation5 + $0x180] sm:$0xff] }
  0x55   :  { %1173 = vmatpush1.bf16.msra.mxu1 %v1172_v26  ;;  %1143 = vmatprep.subr.bf16.mxu0 %v1142_v27  ;;  %v1146_v40 = vpack.c.bf16 %v129_v37, %v121_v36  ;;  %v128_v43 = vld [vmem:[#allocation5 + $0x1c0] sm:$0xff]  ;;  %v1178_v44 = vpack.c.bf16 %v131_v41, %v123_v38  ;;  %v122_v45 = vld [vmem:[#allocation5 + $0x190] sm:$0xff]  ;;  %v137_v47 = vld [vmem:[#allocation5 + $0x208] sm:$0xff] }
  0x56   :  { %1175 = vmatprep.subr.bf16.mxu1 %v1174_v31  ;;  %v130_v46 = vld [vmem:[#allocation5 + $0x1d0] sm:$0xff]  ;;  %v145_v48 = vld [vmem:[#allocation5 + $0x248] sm:$0xff]  ;;  %v139_v49 = vld [vmem:[#allocation5 + $0x218] sm:$0xff]  ;;  %v1148_v51 = vpack.c.bf16 %v128_v43, %v120_v42 }
  0x57   :  { %v147_v50 = vld [vmem:[#allocation5 + $0x258] sm:$0xff]  ;;  %v1180_v52 = vpack.c.bf16 %v130_v46, %v122_v45  ;;  %v1150_v53 = vpack.c.bf16 %v145_v48, %v137_v47  ;;  %v136_v54 = vld [vmem:[#allocation5 + $0x200] sm:$0xff]  ;;  %v138_v56 = vld [vmem:[#allocation5 + $0x210] sm:$0xff] }
  0x58   :  { %1145 = vmatpush1.bf16.msra.mxu0 %v1144_v35  ;;  %v144_v55 = vld [vmem:[#allocation5 + $0x240] sm:$0xff]  ;;  %v1182_v57 = vpack.c.bf16 %v147_v50, %v139_v49  ;;  %v146_v58 = vld [vmem:[#allocation5 + $0x250] sm:$0xff]  ;;  %v153_v59 = vld [vmem:[#allocation5 + $0x288] sm:$0xff] }
  0x59   :  { %1177 = vmatpush1.bf16.msra.mxu1 %v1176_v39  ;;  %1147 = vmatprep.subr.bf16.mxu0 %v1146_v40  ;;  %v161_v60 = vld [vmem:[#allocation5 + $0x2c8] sm:$0xff]  ;;  %v155_v61 = vld [vmem:[#allocation5 + $0x298] sm:$0xff]  ;;  %v1152_v63 = vpack.c.bf16 %v144_v55, %v136_v54  ;;  %v1184_v1 = vpack.c.bf16 %v146_v58, %v138_v56  ;;  %v152_v3 = vld [vmem:[#allocation5 + $0x280] sm:$0xff] }
  0x5a   :  { %1179 = vmatprep.subr.bf16.mxu1 %v1178_v44  ;;  %v163_v62 = vld [vmem:[#allocation5 + $0x2d8] sm:$0xff]  ;;  %v1154_v2 = vpack.c.bf16 %v161_v60, %v153_v59  ;;  %v160_v4 = vld [vmem:[#allocation5 + $0x2c0] sm:$0xff]  ;;  %v154_v5 = vld [vmem:[#allocation5 + $0x290] sm:$0xff] }
  0x5b   :  { %v1186_v6 = vpack.c.bf16 %v163_v62, %v155_v61  ;;  %v162_v7 = vld [vmem:[#allocation5 + $0x2d0] sm:$0xff]  ;;  %v169_v8 = vld [vmem:[#allocation5 + $0x308] sm:$0xff]  ;;  %v171_v10 = vld [vmem:[#allocation5 + $0x318] sm:$0xff]  ;;  %v1156_v12 = vpack.c.bf16 %v160_v4, %v152_v3 }
  0x5c   :  { %1149 = vmatpush1.bf16.msra.mxu0 %v1148_v51  ;;  %v177_v9 = vld [vmem:[#allocation5 + $0x348] sm:$0xff]  ;;  %v179_v11 = vld [vmem:[#allocation5 + $0x358] sm:$0xff]  ;;  %v1188_v13 = vpack.c.bf16 %v162_v7, %v154_v5  ;;  %v168_v15 = vld [vmem:[#allocation5 + $0x300] sm:$0xff] }
  0x5d   :  { %1181 = vmatpush1.bf16.msra.mxu1 %v1180_v52  ;;  %1151 = vmatprep.subr.bf16.mxu0 %v1150_v53  ;;  %v1158_v14 = vpack.c.bf16 %v177_v9, %v169_v8  ;;  %v176_v16 = vld [vmem:[#allocation5 + $0x340] sm:$0xff]  ;;  %v170_v17 = vld [vmem:[#allocation5 + $0x310] sm:$0xff]  ;;  %v1190_v18 = vpack.c.bf16 %v179_v11, %v171_v10  ;;  %v185_v20 = vld [vmem:[#allocation5 + $0x388] sm:$0xff] }
  0x5e   :  { %1183 = vmatprep.subr.bf16.mxu1 %v1182_v57  ;;  %v178_v19 = vld [vmem:[#allocation5 + $0x350] sm:$0xff]  ;;  %v193_v21 = vld [vmem:[#allocation5 + $0x3c8] sm:$0xff]  ;;  %v187_v22 = vld [vmem:[#allocation5 + $0x398] sm:$0xff]  ;;  %v1160_v24 = vpack.c.bf16 %v176_v16, %v168_v15 }
  0x5f   :  { %v195_v23 = vld [vmem:[#allocation5 + $0x3d8] sm:$0xff]  ;;  %v1192_v25 = vpack.c.bf16 %v178_v19, %v170_v17  ;;  %v1162_v26 = vpack.c.bf16 %v193_v21, %v185_v20  ;;  %v184_v27 = vld [vmem:[#allocation5 + $0x380] sm:$0xff]  ;;  %v186_v29 = vld [vmem:[#allocation5 + $0x390] sm:$0xff] }
  0x60   :  { %1153 = vmatpush1.bf16.msra.mxu0 %v1152_v63  ;;  %v192_v28 = vld [vmem:[#allocation5 + $0x3c0] sm:$0xff]  ;;  %v1194_v30 = vpack.c.bf16 %v195_v23, %v187_v22  ;;  %v194_v31 = vld [vmem:[#allocation5 + $0x3d0] sm:$0xff]  ;;  %v77_v32 = vld [vmem:[#allocation5 + $0x28] sm:$0xff] }
  0x61   :  { %1185 = vmatpush1.bf16.msra.mxu1 %v1184_v1  ;;  %1155 = vmatprep.subr.bf16.mxu0 %v1154_v2  ;;  %v85_v33 = vld [vmem:[#allocation5 + $0x68] sm:$0xff]  ;;  %v79_v34 = vld [vmem:[#allocation5 + $0x38] sm:$0xff]  ;;  %v1164_v36 = vpack.c.bf16 %v192_v28, %v184_v27  ;;  %v1196_v37 = vpack.c.bf16 %v194_v31, %v186_v29  ;;  %v76_v39 = vld [vmem:[#allocation5 + $0x20] sm:$0xff] }
  0x62   :  { %1187 = vmatprep.subr.bf16.mxu1 %v1186_v6  ;;  %v87_v35 = vld [vmem:[#allocation5 + $0x78] sm:$0xff]  ;;  %v1198_v38 = vpack.c.bf16 %v85_v33, %v77_v32  ;;  %v84_v40 = vld [vmem:[#allocation5 + $0x60] sm:$0xff]  ;;  %v78_v41 = vld [vmem:[#allocation5 + $0x30] sm:$0xff] }
  0x63   :  { %v1230_v42 = vpack.c.bf16 %v87_v35, %v79_v34  ;;  %v86_v43 = vld [vmem:[#allocation5 + $0x70] sm:$0xff]  ;;  %v93_v44 = vld [vmem:[#allocation5 + $0xa8] sm:$0xff]  ;;  %v95_v46 = vld [vmem:[#allocation5 + $0xb8] sm:$0xff]  ;;  %v1200_v49 = vpack.c.bf16 %v84_v40, %v76_v39 }
  0x64   :  { %1157 = vmatpush1.bf16.msra.mxu0 %v1156_v12  ;;  %v101_v45 = vld [vmem:[#allocation5 + $0xe8] sm:$0xff]  ;;  %v103_v47 = vld [vmem:[#allocation5 + $0xf8] sm:$0xff]  ;;  %v1232_v50 = vpack.c.bf16 %v86_v43, %v78_v41  ;;  %v92_v52 = vld [vmem:[#allocation5 + $0xa0] sm:$0xff] }
  0x65   :  { %1189 = vmatpush1.bf16.msra.mxu1 %v1188_v13  ;;  %1159 = vmatprep.subr.bf16.mxu0 %v1158_v14  ;;  %v1624_v48 = vld [vmem:[#allocation2] sm:$0x1]  ;;  %v1202_v51 = vpack.c.bf16 %v101_v45, %v93_v44  ;;  %v100_v53 = vld [vmem:[#allocation5 + $0xe0] sm:$0xff]  ;;  %v94_v54 = vld [vmem:[#allocation5 + $0xb0] sm:$0xff]  ;;  %v1234_v55 = vpack.c.bf16 %v103_v47, %v95_v46 }
  0x66   :  { %1191 = vmatprep.subr.bf16.mxu1 %v1190_v18  ;;  %v102_v56 = vld [vmem:[#allocation5 + $0xf0] sm:$0xff]  ;;  %v109_v57 = vld [vmem:[#allocation5 + $0x128] sm:$0xff]  ;;  %v111_v59 = vld [vmem:[#allocation5 + $0x138] sm:$0xff]  ;;  %v1204_v61 = vpack.c.bf16 %v100_v53, %v92_v52 }
  0x67   :  { %v117_v58 = vld [vmem:[#allocation5 + $0x168] sm:$0xff]  ;;  %v119_v60 = vld [vmem:[#allocation5 + $0x178] sm:$0xff]  ;;  %v1236_v62 = vpack.c.bf16 %v102_v56, %v94_v54  ;;  %v108_v1 = vld [vmem:[#allocation5 + $0x120] sm:$0xff] }
  0x68   :  { %1161 = vmatpush1.bf16.msra.mxu0 %v1160_v24  ;;  %v1206_v63 = vpack.c.bf16 %v117_v58, %v109_v57  ;;  %v116_v2 = vld [vmem:[#allocation5 + $0x160] sm:$0xff]  ;;  %v110_v3 = vld [vmem:[#allocation5 + $0x130] sm:$0xff]  ;;  %v1238_v4 = vpack.c.bf16 %v119_v60, %v111_v59  ;;  %v125_v6 = vld [vmem:[#allocation5 + $0x1a8] sm:$0xff] }
  0x69   :  { %1193 = vmatpush1.bf16.msra.mxu1 %v1192_v25  ;;  %1163 = vmatprep.subr.bf16.mxu0 %v1162_v26  ;;  %v118_v5 = vld [vmem:[#allocation5 + $0x170] sm:$0xff]  ;;  %v133_v7 = vld [vmem:[#allocation5 + $0x1e8] sm:$0xff]  ;;  %v127_v8 = vld [vmem:[#allocation5 + $0x1b8] sm:$0xff]  ;;  %v1208_v10 = vpack.c.bf16 %v116_v2, %v108_v1 }
  0x6a   :  { %1195 = vmatprep.subr.bf16.mxu1 %v1194_v30  ;;  %v135_v9 = vld [vmem:[#allocation5 + $0x1f8] sm:$0xff]  ;;  %v1240_v11 = vpack.c.bf16 %v118_v5, %v110_v3  ;;  %v1210_v12 = vpack.c.bf16 %v133_v7, %v125_v6  ;;  %v124_v13 = vld [vmem:[#allocation5 + $0x1a0] sm:$0xff]  ;;  %v126_v15 = vld [vmem:[#allocation5 + $0x1b0] sm:$0xff] }
  0x6b   :  { %v132_v14 = vld [vmem:[#allocation5 + $0x1e0] sm:$0xff]  ;;  %v1242_v16 = vpack.c.bf16 %v135_v9, %v127_v8  ;;  %v134_v17 = vld [vmem:[#allocation5 + $0x1f0] sm:$0xff]  ;;  %v141_v18 = vld [vmem:[#allocation5 + $0x228] sm:$0xff] }
  0x6c   :  { %1165 = vmatpush1.bf16.msra.mxu0 %v1164_v36  ;;  %v149_v19 = vld [vmem:[#allocation5 + $0x268] sm:$0xff]  ;;  %v143_v20 = vld [vmem:[#allocation5 + $0x238] sm:$0xff]  ;;  %v1212_v22 = vpack.c.bf16 %v132_v14, %v124_v13  ;;  %v140_v24 = vld [vmem:[#allocation5 + $0x220] sm:$0xff] }
  0x6d   :  { %1197 = vmatpush1.bf16.msra.mxu1 %v1196_v37  ;;  %1199 = vmatprep.subr.bf16.mxu0 %v1198_v38  ;;  %v151_v21 = vld [vmem:[#allocation5 + $0x278] sm:$0xff]  ;;  %v1214_v23 = vpack.c.bf16 %v149_v19, %v141_v18  ;;  %v148_v25 = vld [vmem:[#allocation5 + $0x260] sm:$0xff]  ;;  %v142_v26 = vld [vmem:[#allocation5 + $0x230] sm:$0xff] }
  0x6e   :  { %1231 = vmatprep.subr.bf16.mxu1 %v1230_v42  ;;  %v1246_v27 = vpack.c.bf16 %v151_v21, %v143_v20  ;;  %v150_v28 = vld [vmem:[#allocation5 + $0x270] sm:$0xff]  ;;  %v157_v29 = vld [vmem:[#allocation5 + $0x2a8] sm:$0xff]  ;;  %v159_v31 = vld [vmem:[#allocation5 + $0x2b8] sm:$0xff]  ;;  %v1216_v33 = vpack.c.bf16 %v148_v25, %v140_v24 }
  0x6f   :  { %437 = vmatmul.mubr.f32.vlgmr.msra.gmra.mrb[0].mxu0 %v1624_v48  ;;  %v165_v30 = vld [vmem:[#allocation5 + $0x2e8] sm:$0xff]  ;;  %v167_v32 = vld [vmem:[#allocation5 + $0x2f8] sm:$0xff]  ;;  %v1248_v34 = vpack.c.bf16 %v150_v28, %v142_v26  ;;  %v156_v36 = vld [vmem:[#allocation5 + $0x2a0] sm:$0xff] }
  0x70   :  { %508 = vmatmul.mubr.f32.vlgmr.msra.gmra.mrb[0].mxu1 %v1624_v48  ;;  %1201 = vmatpush1.bf16.msra.mxu0 %v1200_v49  ;;  %v1218_v35 = vpack.c.bf16 %v165_v30, %v157_v29  ;;  %v164_v37 = vld [vmem:[#allocation5 + $0x2e0] sm:$0xff]  ;;  %v158_v38 = vld [vmem:[#allocation5 + $0x2b0] sm:$0xff]  ;;  %v1250_v39 = vpack.c.bf16 %v167_v32, %v159_v31  ;;  %v173_v41 = vld [vmem:[#allocation5 + $0x328] sm:$0xff] }
  0x71   :  { %1233 = vmatpush1.bf16.msra.mxu1 %v1232_v50  ;;  %1203 = vmatprep.subr.bf16.mxu0 %v1202_v51  ;;  %v166_v40 = vld [vmem:[#allocation5 + $0x2f0] sm:$0xff]  ;;  %v181_v42 = vld [vmem:[#allocation5 + $0x368] sm:$0xff]  ;;  %v175_v43 = vld [vmem:[#allocation5 + $0x338] sm:$0xff]  ;;  %v1220_v45 = vpack.c.bf16 %v164_v37, %v156_v36 }
  0x72   :  { %1235 = vmatprep.subr.bf16.mxu1 %v1234_v55  ;;  %578 = vmatprep.mubr.f32.mxu0 %v1542_v0  ;;  %v183_v44 = vld [vmem:[#allocation5 + $0x378] sm:$0xff]  ;;  %v1252_v46 = vpack.c.bf16 %v166_v40, %v158_v38  ;;  %v1222_v47 = vpack.c.bf16 %v181_v42, %v173_v41  ;;  %v172_v49 = vld [vmem:[#allocation5 + $0x320] sm:$0xff]  ;;  %v174_v51 = vld [vmem:[#allocation5 + $0x330] sm:$0xff] }
  0x73   :  { %649 = vmatprep.mubr.f32.mxu1 %v1542_v0  ;;  %v1244_v0 = vpack.c.bf16 %v134_v17, %v126_v15  ;;  %v180_v50 = vld [vmem:[#allocation5 + $0x360] sm:$0xff]  ;;  %v1254_v52 = vpack.c.bf16 %v183_v44, %v175_v43  ;;  %v182_v53 = vld [vmem:[#allocation5 + $0x370] sm:$0xff]  ;;  %v189_v54 = vld [vmem:[#allocation5 + $0x3a8] sm:$0xff] }
  0x74   :  { %1205 = vmatpush1.bf16.msra.mxu0 %v1204_v61  ;;  %v197_v55 = vld [vmem:[#allocation5 + $0x3e8] sm:$0xff]  ;;  %v191_v56 = vld [vmem:[#allocation5 + $0x3b8] sm:$0xff]  ;;  %v1224_v58 = vpack.c.bf16 %v180_v50, %v172_v49  ;;  %v1256_v59 = vpack.c.bf16 %v182_v53, %v174_v51  ;;  %v188_v61 = vld [vmem:[#allocation5 + $0x3a0] sm:$0xff] }
  0x75   :  { %1237 = vmatpush1.bf16.msra.mxu1 %v1236_v62  ;;  %1207 = vmatprep.subr.bf16.mxu0 %v1206_v63  ;;  %v199_v57 = vld [vmem:[#allocation5 + $0x3f8] sm:$0xff]  ;;  %v1226_v60 = vpack.c.bf16 %v197_v55, %v189_v54  ;;  %v196_v62 = vld [vmem:[#allocation5 + $0x3e0] sm:$0xff]  ;;  %v190_v63 = vld [vmem:[#allocation5 + $0x3b0] sm:$0xff] }
  0x76   :  { %1239 = vmatprep.subr.bf16.mxu1 %v1238_v4  ;;  %v1258_v1 = vpack.c.bf16 %v199_v57, %v191_v56  ;;  %v198_v2 = vld [vmem:[#allocation5 + $0x3f0] sm:$0xff]  ;;  %v216_v3 = vld [vmem:[#allocation8 + $0x80] sm:$0xff]  ;;  %v1228_v7 = vpack.c.bf16 %v196_v62, %v188_v61  ;;  %v218_v15 = vld [vmem:[#allocation8 + $0x90] sm:$0xff] }
  0x77   :  { %v217_v4 = vld [vmem:[#allocation8 + $0x88] sm:$0xff]  ;;  %v248_v5 = vld [vmem:[#allocation8 + $0x180] sm:$0xff]  ;;  %v1260_v8 = vpack.c.bf16 %v198_v2, %v190_v63  ;;  %v250_v17 = vld [vmem:[#allocation8 + $0x190] sm:$0xff] }
  0x78   :  { %1209 = vmatpush1.bf16.msra.mxu0 %v1208_v10  ;;  %v249_v6 = vld [vmem:[#allocation8 + $0x188] sm:$0xff]  ;;  %v1262_v9 = vpack.c.bf16 %v217_v4, %v216_v3  ;;  %v200_v10 = vld [vmem:[#allocation8] sm:$0xff]  ;;  %v251_v18 = vld [vmem:[#allocation8 + $0x198] sm:$0xff] }
  0x79   :  { %1241 = vmatpush1.bf16.msra.mxu1 %v1240_v11  ;;  %1211 = vmatprep.subr.bf16.mxu0 %v1210_v12  ;;  %v201_v11 = vld [vmem:[#allocation8 + $0x8] sm:$0xff]  ;;  %v232_v12 = vld [vmem:[#allocation8 + $0x100] sm:$0xff]  ;;  %v1294_v13 = vpack.c.bf16 %v249_v6, %v248_v5  ;;  %v1298_v24 = vpack.c.bf16 %v251_v18, %v250_v17  ;;  %v235_v25 = vld [vmem:[#allocation8 + $0x118] sm:$0xff] }
  0x7a   :  { %1243 = vmatprep.subr.bf16.mxu1 %v1242_v16  ;;  %v233_v14 = vld [vmem:[#allocation8 + $0x108] sm:$0xff]  ;;  %v219_v16 = vld [vmem:[#allocation8 + $0x98] sm:$0xff]  ;;  %v1264_v19 = vpack.c.bf16 %v201_v11, %v200_v10  ;;  %v220_v26 = vld [vmem:[#allocation8 + $0xa0] sm:$0xff] }
  0x7b   :  { %v1296_v20 = vpack.c.bf16 %v233_v14, %v232_v12  ;;  %v1266_v21 = vpack.c.bf16 %v219_v16, %v218_v15  ;;  %v252_v28 = vld [vmem:[#allocation8 + $0x1a0] sm:$0xff]  ;;  %v253_v29 = vld [vmem:[#allocation8 + $0x1a8] sm:$0xff]  ;;  %v223_v40 = vld [vmem:[#allocation8 + $0xb8] sm:$0xff] }
  0x7c   :  { %1213 = vmatpush1.bf16.msra.mxu0 %v1212_v22  ;;  %v202_v22 = vld [vmem:[#allocation8 + $0x10] sm:$0xff]  ;;  %v236_v36 = vld [vmem:[#allocation8 + $0x120] sm:$0xff]  ;;  %v237_v37 = vld [vmem:[#allocation8 + $0x128] sm:$0xff] }
  0x7d   :  { %1245 = vmatpush1.bf16.msra.mxu1 %v1244_v0  ;;  %1215 = vmatprep.subr.bf16.mxu0 %v1214_v23  ;;  %v203_v0 = vld [vmem:[#allocation8 + $0x18] sm:$0xff]  ;;  %v234_v23 = vld [vmem:[#allocation8 + $0x110] sm:$0xff]  ;;  %v225_v53 = vld [vmem:[#allocation8 + $0xc8] sm:$0xff] }
  0x7e   :  { %1247 = vmatprep.subr.bf16.mxu1 %v1246_v27  ;;  %v221_v27 = vld [vmem:[#allocation8 + $0xa8] sm:$0xff]  ;;  %v1268_v30 = vpack.c.bf16 %v203_v0, %v202_v22  ;;  %v1300_v31 = vpack.c.bf16 %v235_v25, %v234_v23  ;;  %v254_v41 = vld [vmem:[#allocation8 + $0x1b0] sm:$0xff]  ;;  %v255_v43 = vld [vmem:[#allocation8 + $0x1b8] sm:$0xff] }
  0x7f   :  { %v1270_v32 = vpack.c.bf16 %v221_v27, %v220_v26  ;;  %v206_v44 = vld [vmem:[#allocation8 + $0x30] sm:$0xff]  ;;  %v239_v50 = vld [vmem:[#allocation8 + $0x138] sm:$0xff]  ;;  %v256_v54 = vld [vmem:[#allocation8 + $0x1c0] sm:$0xff] }
  0x80   :  { %1217 = vmatpush1.bf16.msra.mxu0 %v1216_v33  ;;  %v204_v33 = vld [vmem:[#allocation8 + $0x20] sm:$0xff]  ;;  %v238_v49 = vld [vmem:[#allocation8 + $0x130] sm:$0xff]  ;;  %v257_v56 = vld [vmem:[#allocation8 + $0x1c8] sm:$0xff] }
  0x81   :  { %1249 = vmatpush1.bf16.msra.mxu1 %v1248_v34  ;;  %1219 = vmatprep.subr.bf16.mxu0 %v1218_v35  ;;  %v205_v34 = vld [vmem:[#allocation8 + $0x28] sm:$0xff]  ;;  %v1302_v35 = vpack.c.bf16 %v253_v29, %v252_v28  ;;  %v1308_v51 = vpack.c.bf16 %v239_v50, %v238_v49  ;;  %v208_v57 = vld [vmem:[#allocation8 + $0x40] sm:$0xff]  ;;  %v227_v2 = vld [vmem:[#allocation8 + $0xd8] sm:$0xff] }
  0x82   :  { %1251 = vmatprep.subr.bf16.mxu1 %v1250_v39  ;;  %v1272_v38 = vpack.c.bf16 %v205_v34, %v204_v33  ;;  %v1304_v39 = vpack.c.bf16 %v237_v37, %v236_v36  ;;  %v240_v61 = vld [vmem:[#allocation8 + $0x140] sm:$0xff]  ;;  %v241_v62 = vld [vmem:[#allocation8 + $0x148] sm:$0xff]  ;;  %v258_v3 = vld [vmem:[#allocation8 + $0x1d0] sm:$0xff] }
  0x83   :  { %v1312_v63 = vpack.c.bf16 %v241_v62, %v240_v61  ;;  %v259_v5 = vld [vmem:[#allocation8 + $0x1d8] sm:$0xff]  ;;  %v210_v6 = vld [vmem:[#allocation8 + $0x50] sm:$0xff]  ;;  %v229_v14 = vld [vmem:[#allocation8 + $0xe8] sm:$0xff] }
  0x84   :  { %1221 = vmatpush1.bf16.msra.mxu0 %v1220_v45  ;;  %v207_v45 = vld [vmem:[#allocation8 + $0x38] sm:$0xff]  ;;  %v242_v10 = vld [vmem:[#allocation8 + $0x150] sm:$0xff]  ;;  %v260_v15 = vld [vmem:[#allocation8 + $0x1e0] sm:$0xff] }
  0x85   :  { %1253 = vmatpush1.bf16.msra.mxu1 %v1252_v46  ;;  %1223 = vmatprep.subr.bf16.mxu0 %v1222_v47  ;;  %v1306_v46 = vpack.c.bf16 %v255_v43, %v254_v41  ;;  %v1276_v47 = vpack.c.bf16 %v207_v45, %v206_v44  ;;  %v243_v11 = vld [vmem:[#allocation8 + $0x158] sm:$0xff]  ;;  %v261_v17 = vld [vmem:[#allocation8 + $0x1e8] sm:$0xff]  ;;  %v212_v18 = vld [vmem:[#allocation8 + $0x60] sm:$0xff]  ;;  %v332_v41 = vlaneseq }
  0x86   :  { %1255 = vmatprep.subr.bf16.mxu1 %v1254_v52  ;;  %v224_v52 = vld [vmem:[#allocation8 + $0xc0] sm:$0xff]  ;;  %v1316_v12 = vpack.c.bf16 %v243_v11, %v242_v10  ;;  %v245_v0 = vld [vmem:[#allocation8 + $0x168] sm:$0xff]  ;;  %v231_v25 = vld [vmem:[#allocation8 + $0xf8] sm:$0xff] }
  0x87   :  { %v1278_v55 = vpack.c.bf16 %v225_v53, %v224_v52  ;;  %v244_v22 = vld [vmem:[#allocation8 + $0x160] sm:$0xff]  ;;  %v262_v26 = vld [vmem:[#allocation8 + $0x1f0] sm:$0xff]  ;;  %v263_v28 = vld [vmem:[#allocation8 + $0x1f8] sm:$0xff] }
  0x88   :  { %1225 = vmatpush1.bf16.msra.mxu0 %v1224_v58  ;;  %v209_v58 = vld [vmem:[#allocation8 + $0x48] sm:$0xff]  ;;  %v1320_v23 = vpack.c.bf16 %v245_v0, %v244_v22  ;;  %v214_v29 = vld [vmem:[#allocation8 + $0x70] sm:$0xff]  ;;  %v247_v34 = vld [vmem:[#allocation8 + $0x178] sm:$0xff] }
  0x89   :  { %1257 = vmatpush1.bf16.msra.mxu1 %v1256_v59  ;;  %1227 = vmatprep.subr.bf16.mxu0 %v1226_v60  ;;  %v1310_v59 = vpack.c.bf16 %v257_v56, %v256_v54  ;;  %v1280_v60 = vpack.c.bf16 %v209_v58, %v208_v57  ;;  %v246_v33 = vld [vmem:[#allocation8 + $0x170] sm:$0xff]  ;;  %v280_v36 = vld [vmem:[#allocation8 + $0x280] sm:$0xff]  ;;  %v281_v37 = vld [vmem:[#allocation8 + $0x288] sm:$0xff] }
  0x8a   :  { %1259 = vmatprep.subr.bf16.mxu1 %v1258_v1  ;;  %v226_v1 = vld [vmem:[#allocation8 + $0xd0] sm:$0xff]  ;;  %v1635_v44 = vld [vmem:[#allocation7] sm:$0xff] }
  0x8b   :  { %v1282_v4 = vpack.c.bf16 %v227_v2, %v226_v1 }
  0x8c   :  { %1229 = vmatpush1.bf16.msra.mxu0 %v1228_v7  ;;  %v211_v7 = vld [vmem:[#allocation8 + $0x58] sm:$0xff] }
  0x8d   :  { %1261 = vmatpush1.bf16.msra.mxu1 %v1260_v8  ;;  %1263 = vmatprep.subr.bf16.mxu0 %v1262_v9  ;;  %v1314_v8 = vpack.c.bf16 %v259_v5, %v258_v3  ;;  %v1284_v9 = vpack.c.bf16 %v211_v7, %v210_v6  ;;  %v264_v6 = vld [vmem:[#allocation8 + $0x200] sm:$0xff]  ;;  %v265_v7 = vld [vmem:[#allocation8 + $0x208] sm:$0xff] }
  0x8e   :  { %1295 = vmatprep.subr.bf16.mxu1 %v1294_v13  ;;  %v228_v13 = vld [vmem:[#allocation8 + $0xe0] sm:$0xff]  ;;  %v1328_v0 = vpack.c.bf16 %v265_v7, %v264_v6  ;;  %v321_v6 = vld [vmem:[#allocation8 + $0x3c8] sm:$0xff] }
  0x8f   :  { %579 = vmatmul.mubr.f32.vlgmr.msra.gmra.mrb[2].mxu0 %v1624_v48  ;;  %v1286_v16 = vpack.c.bf16 %v229_v14, %v228_v13  ;;  %v297_v13 = vld [vmem:[#allocation8 + $0x308] sm:$0xff]  ;;  %v282_v14 = vld [vmem:[#allocation8 + $0x290] sm:$0xff] }
  0x90   :  { %650 = vmatmul.mubr.f32.vlgmr.msra.gmra.mrb[2].mxu1 %v1624_v48  ;;  %1265 = vmatpush3.bf16.msra.mxu0 %v1264_v19  ;;  %v222_v48 = vld [vmem:[#allocation8 + $0xb0] sm:$0xff]  ;;  %v213_v19 = vld [vmem:[#allocation8 + $0x68] sm:$0xff] }
  0x91   :  { %1297 = vmatpush3.bf16.msra.mxu1 %v1296_v20  ;;  %1267 = vmatprep.subr.bf16.mxu0 %v1266_v21  ;;  %v1274_v42 = vpack.c.bf16 %v223_v40, %v222_v48  ;;  %v1318_v20 = vpack.c.bf16 %v261_v17, %v260_v15  ;;  %v1288_v21 = vpack.c.bf16 %v213_v19, %v212_v18  ;;  %v313_v48 = vld [vmem:[#allocation8 + $0x388] sm:$0xff]  ;;  %v283_v15 = vld [vmem:[#allocation8 + $0x298] sm:$0xff]  ;;  %v314_v19 = vld [vmem:[#allocation8 + $0x390] sm:$0xff] }
  0x92   :  { %1299 = vmatprep.subr.bf16.mxu1 %v1298_v24  ;;  %v230_v24 = vld [vmem:[#allocation8 + $0xf0] sm:$0xff] }
  0x93   :  { %v1290_v27 = vpack.c.bf16 %v231_v25, %v230_v24 }
  0x94   :  { %1269 = vmatpush3.bf16.msra.mxu0 %v1268_v30  ;;  %v215_v30 = vld [vmem:[#allocation8 + $0x78] sm:$0xff] }
  0x95   :  { %1301 = vmatpush3.bf16.msra.mxu1 %v1300_v31  ;;  %1271 = vmatprep.subr.bf16.mxu0 %v1270_v32  ;;  %v1322_v31 = vpack.c.bf16 %v263_v28, %v262_v26  ;;  %v1292_v32 = vpack.c.bf16 %v215_v30, %v214_v29  ;;  %v1330_v26 = vpack.c.bf16 %v283_v15, %v282_v14  ;;  %v267_v28 = vld [vmem:[#allocation8 + $0x218] sm:$0xff]  ;;  %v298_v29 = vld [vmem:[#allocation8 + $0x310] sm:$0xff]  ;;  %v272_v14 = vld [vmem:[#allocation8 + $0x240] sm:$0xff] }
  0x96   :  { %1303 = vmatprep.subr.bf16.mxu1 %v1302_v35  ;;  %v1324_v35 = vpack.c.bf16 %v247_v34, %v246_v33  ;;  %v284_v33 = vld [vmem:[#allocation8 + $0x2a0] sm:$0xff]  ;;  %v285_v34 = vld [vmem:[#allocation8 + $0x2a8] sm:$0xff] }
  0x97   :  { %v273_v15 = vld [vmem:[#allocation8 + $0x248] sm:$0xff] }
  0x98   :  { %1273 = vmatpush3.bf16.msra.mxu0 %v1272_v38  ;;  %v312_v38 = vld [vmem:[#allocation8 + $0x380] sm:$0xff] }
  0x99   :  { %1305 = vmatpush3.bf16.msra.mxu1 %v1304_v39  ;;  %1275 = vmatprep.subr.bf16.mxu0 %v1274_v42  ;;  %v1326_v39 = vpack.c.bf16 %v281_v37, %v280_v36  ;;  %v1358_v40 = vpack.c.bf16 %v313_v48, %v312_v38  ;;  %v1632_v42 = vshrl.u32 %v332_v41, 7  ;;  %v317_v36 = vld [vmem:[#allocation8 + $0x3a8] sm:$0xff]  ;;  %v268_v48 = vld [vmem:[#allocation8 + $0x220] sm:$0xff] }
  0x9a   :  { %1307 = vmatprep.subr.bf16.mxu1 %v1306_v46  ;;  %v300_v41 = vld [vmem:[#allocation8 + $0x320] sm:$0xff] }
  0x9b   :  { %v334_v43 = vsub.s32 0, %v1632_v42  ;;  %v342_v45 = vsub.s32 2, %v1632_v42  ;;  %v338_v46 = vsub.s32 1, %v1632_v42 }
  0x9c   :  { %1277 = vmatpush3.bf16.msra.mxu0 %v1276_v47  ;;  %v346_v47 = vsub.s32 3, %v1632_v42 }
  0x9d   :  { %1309 = vmatpush3.bf16.msra.mxu1 %v1308_v51  ;;  %1279 = vmatprep.subr.bf16.mxu0 %v1278_v55  ;;  %v335_v49 = vrot.slane %v1635_v44, %v334_v43  ;;  %v343_v50 = vrot.slane %v1635_v44, %v342_v45  ;;  %v339_v51 = vrot.slane %v1635_v44, %v338_v46  ;;  %v350_v43 = vsub.s32 4, %v1632_v42  ;;  %v301_v46 = vld [vmem:[#allocation8 + $0x328] sm:$0xff] }
  0x9e   :  { %1311 = vmatprep.subr.bf16.mxu1 %v1310_v59  ;;  %v347_v52 = vrot.slane %v1635_v44, %v346_v47  ;;  %v358_v47 = vsub.s32 6, %v1632_v42 }
  0xa0   :  { %1281 = vmatpush3.bf16.msra.mxu0 %v1280_v60 }
  0xa1   :  { %1313 = vmatpush3.bf16.msra.mxu1 %v1312_v63  ;;  %1283 = vmatprep.subr.bf16.mxu0 %v1282_v4 }
  0xa2   :  { %1315 = vmatprep.subr.bf16.mxu1 %v1314_v8  ;;  %v296_v8 = vld [vmem:[#allocation8 + $0x300] sm:$0xff] }
  0xa3   :  { %v1360_v25 = vpack.c.bf16 %v297_v13, %v296_v8 }
  0xa4   :  { %1285 = vmatpush3.bf16.msra.mxu0 %v1284_v9 }
  0xa5   :  { %1317 = vmatpush3.bf16.msra.mxu1 %v1316_v12  ;;  %1287 = vmatprep.subr.bf16.mxu0 %v1286_v16 }
  0xa6   :  { %1319 = vmatprep.subr.bf16.mxu1 %v1318_v20  ;;  %v315_v20 = vld [vmem:[#allocation8 + $0x398] sm:$0xff] }
  0xa8   :  { %1289 = vmatpush3.bf16.msra.mxu0 %v1288_v21 }
  0xa9   :  { %1321 = vmatpush3.bf16.msra.mxu1 %v1320_v23  ;;  %1291 = vmatprep.subr.bf16.mxu0 %v1290_v27  ;;  %v266_v27 = vld [vmem:[#allocation8 + $0x210] sm:$0xff] }
  0xaa   :  { %1323 = vmatprep.subr.bf16.mxu1 %v1322_v31  ;;  %v1362_v31 = vpack.c.bf16 %v315_v20, %v314_v19  ;;  %v1332_v37 = vpack.c.bf16 %v267_v28, %v266_v27  ;;  %v305_v20 = vld [vmem:[#allocation8 + $0x348] sm:$0xff]  ;;  %v1344_v28 = vpack.c.bf16 %v273_v15, %v272_v14 }
  0xac   :  { %1293 = vmatpush3.bf16.msra.mxu0 %v1292_v32  ;;  %v299_v32 = vld [vmem:[#allocation8 + $0x318] sm:$0xff] }
  0xad   :  { %1325 = vmatpush3.bf16.msra.mxu1 %v1324_v35  ;;  %1327 = vmatprep.subr.bf16.mxu0 %v1326_v39  ;;  %v316_v35 = vld [vmem:[#allocation8 + $0x3a0] sm:$0xff]  ;;  %v1364_v38 = vpack.c.bf16 %v299_v32, %v298_v29  ;;  %v1334_v39 = vpack.c.bf16 %v285_v34, %v284_v33  ;;  %v274_v32 = vld [vmem:[#allocation8 + $0x250] sm:$0xff]  ;;  %v275_v33 = vld [vmem:[#allocation8 + $0x258] sm:$0xff] }
  0xae   :  { %1359 = vmatprep.subr.bf16.mxu1 %v1358_v40  ;;  %v269_v40 = vld [vmem:[#allocation8 + $0x228] sm:$0xff]  ;;  %v1366_v45 = vpack.c.bf16 %v317_v36, %v316_v35  ;;  %v306_v34 = vld [vmem:[#allocation8 + $0x350] sm:$0xff]  ;;  %v307_v36 = vld [vmem:[#allocation8 + $0x358] sm:$0xff] }
 0x142   :  { %v438_v53 = vpop.f32.mrb[0].mxu0 }
 0x143   :  { %v439_v54 = vadd.f32 %v438_v53, %v335_v49  ;;  %v509_v55 = vpop.f32.mrb[0].mxu1  ;;  %v440_v56 = vpop.f32.mrb[1].mxu0  ;;  %v354_v49 = vsub.s32 5, %v1632_v42  ;;  %v318_v53 = vld [vmem:[#allocation8 + $0x3b0] sm:$0xff] }
 0x144   :  { %v510_v57 = vadd.f32 %v509_v55, %v343_v50  ;;  %v441_v58 = vadd.f32 %v440_v56, %v339_v51  ;;  %v511_v59 = vpop.f32.mrb[1].mxu1  ;;  %v286_v50 = vld [vmem:[#allocation8 + $0x2b0] sm:$0xff]  ;;  %v287_v51 = vld [vmem:[#allocation8 + $0x2b8] sm:$0xff]  ;;  %v1336_v55 = vpack.c.bf16 %v269_v40, %v268_v48  ;;  %v1368_v56 = vpack.c.bf16 %v301_v46, %v300_v41  ;;  %v325_v48 = vld [vmem:[#allocation8 + $0x3e8] sm:$0xff] }
 0x145   :  { %v664_v60 = vmul.f32 0.70710677, %v439_v54  ;;  %v512_v61 = vadd.f32 %v511_v59, %v347_v52  ;;  %v656_v16 = vmul.f32 0.5, %v439_v54  ;;  %v362_v52 = vsub.s32 7, %v1632_v42  ;;  %v319_v54 = vld [vmem:[#allocation8 + $0x3b8] sm:$0xff]  ;;  %v270_v59 = vld [vmem:[#allocation8 + $0x230] sm:$0xff] }
 0x146   :  { %v666_v62 = vmul.f32 0.70710677, %v510_v57  ;;  %v665_v63 = vmul.f32 0.70710677, %v441_v58  ;;  %v657_v11 = vmul.f32 0.5, %v441_v58  ;;  %v658_v21 = vmul.f32 0.5, %v510_v57 }
 0x147   :  { %1400 = verf.f32 %v664_v60  ;;  %v667_v1 = vmul.f32 0.70710677, %v512_v61  ;;  %v659_v17 = vmul.f32 0.5, %v512_v61  ;;  %v351_v57 = vrot.slane %v1635_v44, %v350_v43  ;;  %v271_v60 = vld [vmem:[#allocation8 + $0x238] sm:$0xff]  ;;  %v302_v61 = vld [vmem:[#allocation8 + $0x330] sm:$0xff]  ;;  %v277_v46 = vld [vmem:[#allocation8 + $0x268] sm:$0xff] }
 0x148   :  { %1402 = verf.f32 %v666_v62  ;;  %v1338_v58 = vpack.c.bf16 %v287_v51, %v286_v50  ;;  %v359_v62 = vrot.slane %v1635_v44, %v358_v47  ;;  %v303_v42 = vld [vmem:[#allocation8 + $0x338] sm:$0xff]  ;;  %v1340_v8 = vpack.c.bf16 %v271_v60, %v270_v59  ;;  %v308_v47 = vld [vmem:[#allocation8 + $0x360] sm:$0xff]  ;;  %v309_v50 = vld [vmem:[#allocation8 + $0x368] sm:$0xff] }
 0x149   :  { %1404 = verf.f32 %v665_v63  ;;  %v355_v63 = vrot.slane %v1635_v44, %v354_v49  ;;  %v1348_v40 = vpack.c.bf16 %v275_v33, %v274_v32  ;;  %v1380_v41 = vpack.c.bf16 %v307_v36, %v306_v34  ;;  %v294_v51 = vld [vmem:[#allocation8 + $0x2f0] sm:$0xff]  ;;  %v279_v59 = vld [vmem:[#allocation8 + $0x278] sm:$0xff] }
 0x14a   :  { %1406 = verf.f32 %v667_v1  ;;  %v1370_v1 = vpack.c.bf16 %v319_v54, %v318_v53  ;;  %v326_v53 = vld [vmem:[#allocation8 + $0x3f0] sm:$0xff]  ;;  %v327_v54 = vld [vmem:[#allocation8 + $0x3f8] sm:$0xff] }
 0x14b   :  { %v1386_v60 = vpack.c.bf16 %v327_v54, %v326_v53 }
 0x151   :  { %v1401_v2 = vpop.eup %1400 }
 0x152   :  { %v1403_v3 = vpop.eup %1402  ;;  %v680_v5 = vadd.f32 1.0, %v1401_v2  ;;  %v288_v2 = vld [vmem:[#allocation8 + $0x2c0] sm:$0xff] }
 0x153   :  { %v1405_v4 = vpop.eup %1404  ;;  %v682_v10 = vadd.f32 1.0, %v1403_v3  ;;  %v289_v3 = vld [vmem:[#allocation8 + $0x2c8] sm:$0xff] }
 0x154   :  { %v1407_v9 = vpop.eup %1406  ;;  %v681_v12 = vadd.f32 1.0, %v1405_v4  ;;  %v688_v23 = vmul.f32 %v680_v5, %v656_v16  ;;  %v363_v4 = vrot.slane %v1635_v44, %v362_v52  ;;  %v320_v5 = vld [vmem:[#allocation8 + $0x3c0] sm:$0xff]  ;;  %v1342_v13 = vpack.c.bf16 %v289_v3, %v288_v2  ;;  %v295_v52 = vld [vmem:[#allocation8 + $0x2f8] sm:$0xff] }
 0x155   :  { %v683_v18 = vadd.f32 1.0, %v1407_v9  ;;  %v690_v30 = vmul.f32 %v682_v10, %v658_v21  ;;  %v304_v16 = vld [vmem:[#allocation8 + $0x340] sm:$0xff]  ;;  %v1374_v19 = vpack.c.bf16 %v321_v6, %v320_v5  ;;  %v290_v21 = vld [vmem:[#allocation8 + $0x2d0] sm:$0xff] }
 0x156   :  { %v689_v22 = vmul.f32 %v681_v12, %v657_v11  ;;  %v1372_v12 = vpack.c.bf16 %v303_v42, %v302_v61  ;;  %v310_v61 = vld [vmem:[#allocation8 + $0x370] sm:$0xff] }
 0x157   :  { %v691_v24 = vmul.f32 %v683_v18, %v659_v17 }
 0x158   :  { %760 = vmatprep.mubr.f32.mxu0 %v689_v22  ;;  %v291_v22 = vld [vmem:[#allocation8 + $0x2d8] sm:$0xff] }
 0x159   :  { %830 = vmatprep.mubr.f32.mxu1 %v691_v24  ;;  %761 = vmatmul.mubr.f32.vlgmr.msra.gmra.mrb[4].mxu0 %v688_v23  ;;  %v322_v24 = vld [vmem:[#allocation8 + $0x3d0] sm:$0xff] }
 0x15a   :  { %831 = vmatmul.mubr.f32.vlgmr.msra.gmra.mrb[4].mxu1 %v690_v30  ;;  %1329 = vmatpush3.bf16.msra.mxu0 %v1328_v0  ;;  %v1376_v30 = vpack.c.bf16 %v305_v20, %v304_v16 }
 0x15b   :  { %1361 = vmatpush3.bf16.msra.mxu1 %v1360_v25  ;;  %1331 = vmatprep.subr.bf16.mxu0 %v1330_v26  ;;  %v323_v25 = vld [vmem:[#allocation8 + $0x3d8] sm:$0xff] }
 0x15c   :  { %1363 = vmatprep.subr.bf16.mxu1 %v1362_v31  ;;  %v1346_v31 = vpack.c.bf16 %v291_v22, %v290_v21  ;;  %v1378_v35 = vpack.c.bf16 %v323_v25, %v322_v24 }
 0x15e   :  { %1333 = vmatpush3.bf16.msra.mxu0 %v1332_v37  ;;  %v292_v37 = vld [vmem:[#allocation8 + $0x2e0] sm:$0xff] }
 0x15f   :  { %1365 = vmatpush3.bf16.msra.mxu1 %v1364_v38  ;;  %1335 = vmatprep.subr.bf16.mxu0 %v1334_v39  ;;  %v293_v38 = vld [vmem:[#allocation8 + $0x2e8] sm:$0xff]  ;;  %v324_v39 = vld [vmem:[#allocation8 + $0x3e0] sm:$0xff] }
 0x160   :  { %1367 = vmatprep.subr.bf16.mxu1 %v1366_v45  ;;  %v1350_v43 = vpack.c.bf16 %v293_v38, %v292_v37  ;;  %v276_v45 = vld [vmem:[#allocation8 + $0x260] sm:$0xff]  ;;  %v1382_v49 = vpack.c.bf16 %v325_v48, %v324_v39 }
 0x162   :  { %1337 = vmatpush3.bf16.msra.mxu0 %v1336_v55  ;;  %v580_v7 = vpop.f32.mrb[2].mxu0  ;;  %v1352_v55 = vpack.c.bf16 %v277_v46, %v276_v45 }
 0x163   :  { %1369 = vmatpush3.bf16.msra.mxu1 %v1368_v56  ;;  %v1652_v9 = vadd.f32 %v580_v7, %v351_v57  ;;  %v651_v10 = vpop.f32.mrb[2].mxu1  ;;  %v582_v11 = vpop.f32.mrb[3].mxu0  ;;  %1339 = vmatprep.subr.bf16.mxu0 %v1338_v58  ;;  %v1384_v56 = vpack.c.bf16 %v309_v50, %v308_v47  ;;  %v1354_v57 = vpack.c.bf16 %v295_v52, %v294_v51  ;;  %v278_v58 = vld [vmem:[#allocation8 + $0x270] sm:$0xff] }
 0x164   :  { %v1654_v17 = vadd.f32 %v651_v10, %v359_v62  ;;  %v1656_v18 = vadd.f32 %v582_v11, %v355_v63  ;;  %v653_v44 = vpop.f32.mrb[3].mxu1  ;;  %1371 = vmatprep.subr.bf16.mxu1 %v1370_v1  ;;  %v311_v62 = vld [vmem:[#allocation8 + $0x378] sm:$0xff]  ;;  %v1356_v42 = vpack.c.bf16 %v279_v59, %v278_v58 }
 0x165   :  { %v668_v0 = vmul.f32 0.70710677, %v1652_v9  ;;  %v1659_v23 = vadd.f32 %v653_v44, %v363_v4  ;;  %v1388_v4 = vpack.c.bf16 %v311_v62, %v310_v61  ;;  %v660_v10 = vmul.f32 0.5, %v1652_v9  ;;  %v329_v9 = vld [vmem:[%s1687_s4] sm:$0x1]  ;;  %s1508_s4 = scalar_lea.vmem %s984_s19, 32 }
 0x166   :  { %v670_v26 = vmul.f32 0.70710677, %v1654_v17  ;;  %v669_v27 = vmul.f32 0.70710677, %v1656_v18  ;;  %1341 = vmatpush3.bf16.msra.mxu0 %v1340_v8  ;;  %v661_v7 = vmul.f32 0.5, %v1656_v18  ;;  %p1510_p6 = scmp.lt.s32.totalorder %s1508_s4, %s1504_s20 }
 0x167   :  { %1408 = verf.f32 %v668_v0  ;;  %v671_v29 = vmul.f32 0.70710677, %v1659_v23  ;;  %1373 = vmatpush3.bf16.msra.mxu1 %v1372_v12  ;;  %1343 = vmatprep.subr.bf16.mxu0 %v1342_v13  ;;  %v663_v11 = vmul.f32 0.5, %v1659_v23  ;;  %v662_v13 = vmul.f32 0.5, %v1654_v17 }
 0x168   :  { %1410 = verf.f32 %v670_v26  ;;  %1375 = vmatprep.subr.bf16.mxu1 %v1374_v19  ;;  %p1511_p7 = por %p1510_p6, %p1509_p5 }
 0x169   :  { %1412 = verf.f32 %v669_v27 }
 0x16a   :  { %1414 = verf.f32 %v671_v29  ;;  %1345 = vmatpush3.bf16.msra.mxu0 %v1344_v28  ;;  %p1512_p8 = pnand %p1511_p7, %p1505_p4 }
 0x16b   :  { %1377 = vmatpush3.bf16.msra.mxu1 %v1376_v30  ;;  %1347 = vmatprep.subr.bf16.mxu0 %v1346_v31 }
 0x16c   :  { %1379 = vmatprep.subr.bf16.mxu1 %v1378_v35 }
 0x16e   :  { %1349 = vmatpush3.bf16.msra.mxu0 %v1348_v40 }
 0x16f   :  { %1381 = vmatpush3.bf16.msra.mxu1 %v1380_v41  ;;  %1351 = vmatprep.subr.bf16.mxu0 %v1350_v43 }
 0x170   :  { %1383 = vmatprep.subr.bf16.mxu1 %v1382_v49 }
 0x171   :  { %v1409_v63 = vpop.eup %1408 }
 0x172   :  { %v1411_v1 = vpop.eup %1410  ;;  %1353 = vmatpush3.bf16.msra.mxu0 %v1352_v55  ;;  %v684_v3 = vadd.f32 1.0, %v1409_v63 }
 0x173   :  { %v1413_v2 = vpop.eup %1412  ;;  %1385 = vmatpush3.bf16.msra.mxu1 %v1384_v56  ;;  %1355 = vmatprep.subr.bf16.mxu0 %v1354_v57  ;;  %v686_v6 = vadd.f32 1.0, %v1411_v1 }
 0x174   :  { %v1415_v5 = vpop.eup %1414  ;;  %v685_v8 = vadd.f32 1.0, %v1413_v2  ;;  %1387 = vmatprep.subr.bf16.mxu1 %v1386_v60  ;;  %v692_v15 = vmul.f32 %v684_v3, %v660_v10 }
 0x175   :  { %v687_v12 = vadd.f32 1.0, %v1415_v5  ;;  %v694_v44 = vmul.f32 %v686_v6, %v662_v13 }
 0x176   :  { %1357 = vmatpush3.bf16.msra.mxu0 %v1356_v42  ;;  %v693_v14 = vmul.f32 %v685_v8, %v661_v7 }
 0x177   :  { %1389 = vmatpush3.bf16.msra.mxu1 %v1388_v4  ;;  %v695_v16 = vmul.f32 %v687_v12, %v663_v11 }
 0x178   :  { %900 = vmatprep.mubr.f32.mxu0 %v693_v14 }
 0x179   :  { %970 = vmatprep.mubr.f32.mxu1 %v695_v16  ;;  %901 = vmatmul.mubr.f32.vlgmr.msra.gmra.mrb[6].mxu0 %v692_v15 }
 0x17a   :  { %971 = vmatmul.mubr.f32.vlgmr.msra.gmra.mrb[6].mxu1 %v694_v44 }
 0x22c   :  { %v1026_v18 = vpop.f32.mrb[4].mxu0 }
 0x22d   :  { %v1061_v19 = vpop.f32.mrb[4].mxu1  ;;  %v1027_v20 = vpop.f32.mrb[5].mxu0 }
 0x22e   :  { %v1028_v21 = vadd.f32 %v1027_v20, %v1026_v18  ;;  %v1062_v22 = vpop.f32.mrb[5].mxu1 }
 0x22f   :  { %v1063_v17 = vadd.f32 %v1062_v22, %v1061_v19 }
 0x230   :  { %v763_v0 = vadd.f32 %v1028_v21, %v329_v9 }
 0x232   :  { %v833_v23 = vadd.f32 %v1063_v17, %v763_v0 }
 0x24c   :  { %v1096_v24 = vpop.f32.mrb[6].mxu0 }
 0x24d   :  { %v1131_v25 = vpop.f32.mrb[6].mxu1  ;;  %v1097_v26 = vpop.f32.mrb[7].mxu0 }
 0x24e   :  { %v1098_v27 = vadd.f32 %v1097_v26, %v1096_v24  ;;  %v1132_v28 = vpop.f32.mrb[7].mxu1 }
 0x24f   :  { %v1133_v29 = vadd.f32 %v1132_v28, %v1131_v25 }
 0x250   :  { %v903_v30 = vadd.f32 %v1098_v27, %v833_v23 }
 0x252   :  { %v973_v31 = vadd.f32 %v1133_v29, %v903_v30 }
 0x254   :  { %976 = vst [vmem:[#allocation10] sm:$0x1] %v973_v31 }
 0x255   :  { %1515 = shalt.err (!%p1512_p8)
}
 0x256   :  { %s1516_s23 = scalar_lea.hbm %s1688_s5, 16 }
 0x257   :  { %p1517_p9 = scmp.ne.s32.totalorder %s1688_s5, %s1516_s23  ;;  %p1520_p10 = scmp.lt.u32.totalorder %s1516_s23, %s1688_s5 }
 0x259   :  { %p1522_p11 = pnand %p1520_p10, %p1517_p9 }
 0x25b   :  { %1525 = shalt.err (!%p1522_p11)
}
 0x25c   :  { %986 = dma.vmem_to_hbm [thread:$0]  %s984_s19, 16, %s1688_s5, [#allocation4]  }
 0x25d   :  { %1532 = dma.done.wait [#allocation4], 16  }
 0x25e   :  { %1533 = vsyncadd [#allocation4], 4294967280 }
 0x25f   :  { %990 = vsyncpa [#allocation3], 1 }
 0x260   :  { %991 = vsyncpa [#allocation6], 1 }
 0x261   :  { %992 = vsyncpa [#allocation9], 1 }
 0x262   :  { %993 = vsyncpa [#allocation4], 1 }

</bundles_post_ra>
